<compile_context>
chip_gen: v7x
topology: tpu7x:2x2x1
jax: 0.10.0
libtpu: 0.0.40
codegen_flags: <defaults>
</compile_context>

<pallas_src>
import functools

import jax
import jax.numpy as jnp
from jax.experimental import pallas as pl
from jax.experimental.pallas import tpu as pltpu

LANES = 128                      # vreg lane width
SUBLANES = 8                     # f32 sublane tile
MAX_TILE_ROWS = 4096             # 2 MiB (f32) of useful bytes per input per step
MIN_KERNEL_ROWS = 16             # below this, pure jnp is cheaper than a launch
VMEM_LIMIT_BYTES = 32 * 1024 * 1024


def _num_accum_segments() -> int:
    """2 accumulator segments (one per TensorCore) on v7x, 1 on v5e/v6e."""
    try:
        kind = jax.devices()[0].device_kind.lower()
    except Exception:  # pragma: no cover - non-TPU fallback
        kind = ""
    return 2 if "v7" in kind else 1


NC = _num_accum_segments()


def _kl_kernel(logvar_ref, mean_ref, out_ref, *, rows_total, tile_rows,
               tiles_per_core):
    c = pl.program_id(0)   # accumulator segment ("parallel"; megacore on v7x)
    i = pl.program_id(1)   # reduction axis ("arbitrary")

    # Fresh accumulator block at the start of each segment.
    @pl.when(i == 0)
    def _():
        out_ref[...] = jnp.zeros_like(out_ref)

    lv = logvar_ref[...].astype(jnp.float32)
    mu = mean_ref[...].astype(jnp.float32)
    lv2 = lv * lv
    # NOTE: log(logvar**2) is -inf when logvar == 0, matching the PyTorch ref.
    # The per-element "- 1/2" is applied once in the wrapper.
    term = lv2 + mu * mu - jnp.log(lv2)

    def fold(x):
        # (tile_rows, 128) -> (8, 128) with plain VPU adds; no cross-lane work.
        return x.reshape(tile_rows // SUBLANES, SUBLANES, LANES).sum(axis=0)

    # Valid rows in this tile (row granularity is exact because the kernel only
    # ever sees lane-aligned data). Scalar arithmetic stays small -> no overflow.
    tile_idx = c * tiles_per_core + i
    row_limit = rows_total - tile_idx * tile_rows

    # Fast path: full tile, no masking at all.
    @pl.when(row_limit >= tile_rows)
    def _():
        out_ref[...] += fold(term)

    # Ragged last tile: mask the garbage rows that the partial DMA left behind.
    @pl.when(jnp.logical_and(row_limit > 0, row_limit < tile_rows))
    def _():
        row_ids = jax.lax.broadcasted_iota(jnp.int32, term.shape, 0)
        out_ref[...] += fold(jnp.where(row_ids < row_limit, term,
                                       jnp.float32(0.0)))
    # row_limit <= 0 (clamped duplicate tile when NC > 1): skip the accumulate.


def _kl_sum_jnp(lv: jax.Array, mu: jax.Array) -> jax.Array:
    """Tiny pure-jnp path (tails / very small inputs); no -1/2 term."""
    lv = lv.astype(jnp.float32)
    mu = mu.astype(jnp.float32)
    lv2 = lv * lv
    return jnp.sum(lv2 + mu * mu - jnp.log(lv2))


@jax.jit
def kullback_leibler(logvar: jax.Array, mean: jax.Array) -> jax.Array:
    """KL divergence loss matching the PyTorch module's forward exactly."""
    assert logvar.shape == mean.shape, "logvar and mean must have the same shape"
    out_dtype = jnp.promote_types(logvar.dtype, mean.dtype)

    n = logvar.size
    lv = jnp.ravel(logvar)
    mu = jnp.ravel(mean)

    n_main = (n // LANES) * LANES          # lane-aligned prefix handled by kernel
    rows = n_main // LANES

    if rows < MIN_KERNEL_ROWS:
        # Very small input: a kernel launch is pure overhead.
        total = _kl_sum_jnp(lv, mu)
    else:
        # <128-element tail summed here; avoids any full-array pad/concat copy.
        if n_main < n:
            tail = _kl_sum_jnp(lv[n_main:], mu[n_main:])
        else:
            tail = jnp.float32(0.0)

        lv_main = lv if n_main == n else lv[:n_main]
        mu_main = mu if n_main == n else mu[:n_main]
        lv2d = lv_main.reshape(rows, LANES)
        mu2d = mu_main.reshape(rows, LANES)

        # Tile rows: multiple of 16 (legal for f32 and bf16), never larger than
        # the array, so the only boundary case is a standard ragged last block.
        tile_rows = min(MAX_TILE_ROWS, (rows // 16) * 16)
        num_tiles = pl.cdiv(rows, tile_rows)
        tiles_per_core = pl.cdiv(num_tiles, NC)

        def in_map(c, i):
            # Clamp so no block starts past the end of the array; clamped
            # duplicates contribute nothing (row_limit <= 0 skips them).
            return (jnp.minimum(c * tiles_per_core + i, num_tiles - 1), 0)

        kernel = functools.partial(
            _kl_kernel, rows_total=rows, tile_rows=tile_rows,
            tiles_per_core=tiles_per_core)

        in_bytes = (lv2d.size * lv2d.dtype.itemsize
                    + mu2d.size * mu2d.dtype.itemsize)
        cost = pl.CostEstimate(
            flops=6 * n_main,
            transcendentals=n_main,
            bytes_accessed=in_bytes + NC * SUBLANES * LANES * 4,
        )

        partial_sums = pl.pallas_call(
            kernel,
            out_shape=jax.ShapeDtypeStruct((NC * SUBLANES, LANES), jnp.float32),
            grid_spec=pltpu.PrefetchScalarGridSpec(
                num_scalar_prefetch=0,
                grid=(NC, tiles_per_core),
                in_specs=[
                    pl.BlockSpec((tile_rows, LANES), in_map),
                    pl.BlockSpec((tile_rows, LANES), in_map),
                ],
                out_specs=pl.BlockSpec((SUBLANES, LANES), lambda c, i: (c, 0)),
            ),
            compiler_params=pltpu.CompilerParams(
                # TODO(synk): verify "parallel" shards the NC axis across both
                # TensorCores on v7x; switch to pltpu.CORE_PARALLEL if it does not.
                dimension_semantics=("parallel", "arbitrary"),
                vmem_limit_bytes=VMEM_LIMIT_BYTES,
            ),
            cost_estimate=cost,
        )(lv2d, mu2d)

        # Tiny final reduction (NC*8*128 f32) of the per-segment accumulators.
        total = jnp.sum(partial_sums) + tail

    # Apply the per-element "- 1/2" once for all n elements.
    return (total - 0.5 * n).astype(out_dtype)


if __name__ == "__main__":
    key = jax.random.PRNGKey(0)
    k1, k2, k3, k4 = jax.random.split(key, 4)

    def reference(logvar, mean):
        lv2 = logvar.astype(jnp.float32) ** 2
        return jnp.sum(lv2 + mean.astype(jnp.float32) ** 2 - jnp.log(lv2) - 0.5)

    # Small NCHW-like shape, as a VAE head would produce (2048 elems, aligned).
    shape = (2, 4, 16, 16)
    # Keep logvar away from 0 so log(logvar**2) is finite (log(0) = -inf in
    # both frameworks; that behavior is preserved but not useful to test).
    logvar = jax.random.uniform(k1, shape, jnp.float32, minval=0.1, maxval=2.0)
    mean = jax.random.normal(k2, shape, jnp.float32)

    loss = kullback_leibler(logvar, mean)
    jax.block_until_ready(loss)
    ref = reference(logvar, mean)
    assert jnp.allclose(loss, ref, rtol=1e-5, atol=1e-4), (loss, ref)

    # Misaligned shape (2553 elems): exercises the ragged row tile + jnp tail.
    shape2 = (3, 23, 37)
    logvar2 = jax.random.uniform(k3, shape2, jnp.float32, minval=0.1, maxval=2.0)
    mean2 = jax.random.normal(k4, shape2, jnp.float32)

    loss2 = kullback_leibler(logvar2, mean2)
    jax.block_until_ready(loss2)
    ref2 = reference(logvar2, mean2)
    assert jnp.allclose(loss2, ref2, rtol=1e-5, atol=1e-4), (loss2, ref2)

    print("KERNEL_OK")
</pallas_src>

<mosaic_0001>
module attributes {stable_mosaic.version = 11 : i64} {
  func.func @_kl_kernel(%arg0: i32, %arg1: i32, %arg2: memref<16x128xf32, #tpu.memory_space<vmem>>, %arg3: memref<16x128xf32, #tpu.memory_space<vmem>>, %arg4: memref<8x128xf32, #tpu.memory_space<vmem>>) attributes {dimension_semantics = [#tpu.dimension_semantics<parallel>, #tpu.dimension_semantics<arbitrary>], iteration_bounds = array<i64: 1, 1>, scalar_prefetch = 0 : i64, scratch_operands = 0 : i64, tpu.core_type = #tpu.core_type<tc>, window_params = [{transform_indices = @transform_0, window_bounds = array<i64: 16, 128>}, {transform_indices = @transform_1, window_bounds = array<i64: 16, 128>}, {transform_indices = @transform_2, window_bounds = array<i64: 8, 128>}]} {
    %c0_i32 = arith.constant 0 : i32
    %0 = arith.cmpi eq, %arg1, %c0_i32 : i32
    %1 = arith.extui %0 : i1 to i32
    %c0_i32_0 = arith.constant 0 : i32
    %2 = arith.cmpi ne, %1, %c0_i32_0 : i32
    scf.if %2 {
      %cst = arith.constant 0.000000e+00 : f32
      %22 = vector.broadcast %cst : f32 to vector<8x128xf32>
      %c0_10 = arith.constant 0 : index
      %c0_11 = arith.constant 0 : index
      %23 = vector.load %arg4[%c0_10, %c0_11] : memref<8x128xf32, #tpu.memory_space<vmem>>, vector<8x128xf32>
      tpu.vector_store %arg4[%c0_10, %c0_11], %22 {strides = array<i32>} : memref<8x128xf32, #tpu.memory_space<vmem>>, vector<8x128xf32>,
    } else {
    }
    %c0 = arith.constant 0 : index
    %c0_1 = arith.constant 0 : index
    %3 = vector.load %arg2[%c0, %c0_1] : memref<16x128xf32, #tpu.memory_space<vmem>>, vector<16x128xf32>
    %c0_2 = arith.constant 0 : index
    %c0_3 = arith.constant 0 : index
    %4 = vector.load %arg3[%c0_2, %c0_3] : memref<16x128xf32, #tpu.memory_space<vmem>>, vector<16x128xf32>
    %5 = arith.mulf %3, %3 : vector<16x128xf32>
    %6 = arith.mulf %4, %4 : vector<16x128xf32>
    %7 = arith.addf %5, %6 : vector<16x128xf32>
    %8 = math.log %5 : vector<16x128xf32>
    %9 = arith.subf %7, %8 : vector<16x128xf32>
    %c1_i32 = arith.constant 1 : i32
    %10 = arith.muli %arg0, %c1_i32 : i32
    %11 = arith.addi %10, %arg1 : i32
    %c16_i32 = arith.constant 16 : i32
    %12 = arith.muli %11, %c16_i32 : i32
    %c16_i32_4 = arith.constant 16 : i32
    %13 = arith.subi %c16_i32_4, %12 : i32
    %c16_i32_5 = arith.constant 16 : i32
    %14 = arith.cmpi sge, %13, %c16_i32_5 : i32
    %15 = arith.extui %14 : i1 to i32
    %c0_i32_6 = arith.constant 0 : i32
    %16 = arith.cmpi ne, %15, %c0_i32_6 : i32
    scf.if %16 {
      %c0_10 = arith.constant 0 : index
      %c0_11 = arith.constant 0 : index
      %22 = vector.load %arg4[%c0_10, %c0_11] : memref<8x128xf32, #tpu.memory_space<vmem>>, vector<8x128xf32>
      %23 = vector.shape_cast %9 : vector<16x128xf32> to vector<2x8x128xf32>
      %cst = arith.constant dense<0.000000e+00> : vector<8x128xf32>
      %24 = vector.multi_reduction <add>, %23, %cst [0] : vector<2x8x128xf32> to vector<8x128xf32>
      %25 = arith.addf %22, %24 : vector<8x128xf32>
      %c0_12 = arith.constant 0 : index
      %c0_13 = arith.constant 0 : index
      %26 = vector.load %arg4[%c0_12, %c0_13] : memref<8x128xf32, #tpu.memory_space<vmem>>, vector<8x128xf32>
      tpu.vector_store %arg4[%c0_12, %c0_13], %25 {strides = array<i32>} : memref<8x128xf32, #tpu.memory_space<vmem>>, vector<8x128xf32>,
    } else {
    }
    %c0_i32_7 = arith.constant 0 : i32
    %17 = arith.cmpi sgt, %13, %c0_i32_7 : i32
    %c16_i32_8 = arith.constant 16 : i32
    %18 = arith.cmpi slt, %13, %c16_i32_8 : i32
    %19 = arith.andi %17, %18 : i1
    %20 = arith.extui %19 : i1 to i32
    %c0_i32_9 = arith.constant 0 : i32
    %21 = arith.cmpi ne, %20, %c0_i32_9 : i32
    scf.if %21 {
      %22 = tpu.iota {dimensions = array<i32: 0>} : vector<16x128xi32>
      %c0_10 = arith.constant 0 : index
      %c0_11 = arith.constant 0 : index
      %23 = vector.load %arg4[%c0_10, %c0_11] : memref<8x128xf32, #tpu.memory_space<vmem>>, vector<8x128xf32>
      %24 = vector.broadcast %13 : i32 to vector<16x128xi32>
      %25 = arith.cmpi slt, %22, %24 : vector<16x128xi32>
      %cst = arith.constant 0.000000e+00 : f32
      %26 = vector.broadcast %cst : f32 to vector<16x128xf32>
      %27 = arith.select %25, %9, %26 : vector<16x128xi1>, vector<16x128xf32>
      %28 = vector.shape_cast %27 : vector<16x128xf32> to vector<2x8x128xf32>
      %cst_12 = arith.constant dense<0.000000e+00> : vector<8x128xf32>
      %29 = vector.multi_reduction <add>, %28, %cst_12 [0] : vector<2x8x128xf32> to vector<8x128xf32>
      %30 = arith.addf %23, %29 : vector<8x128xf32>
      %c0_13 = arith.constant 0 : index
      %c0_14 = arith.constant 0 : index
      %31 = vector.load %arg4[%c0_13, %c0_14] : memref<8x128xf32, #tpu.memory_space<vmem>>, vector<8x128xf32>
      tpu.vector_store %arg4[%c0_13, %c0_14], %30 {strides = array<i32>} : memref<8x128xf32, #tpu.memory_space<vmem>>, vector<8x128xf32>,
    } else {
    }
    return
  }
  func.func @transform_0(%arg0: i32, %arg1: i32) -> (i32, i32) {
    %c1_i32 = arith.constant 1 : i32
    %0 = arith.muli %arg0, %c1_i32 : i32
    %1 = arith.addi %0, %arg1 : i32
    %c0_i32 = arith.constant 0 : i32
    %2 = arith.minsi %1, %c0_i32 : i32
    %c0_i32_0 = arith.constant 0 : i32
    %c0_i32_1 = arith.constant 0 : i32
    return %2, %c0_i32_0 : i32, i32
  }
  func.func @transform_1(%arg0: i32, %arg1: i32) -> (i32, i32) {
    %c1_i32 = arith.constant 1 : i32
    %0 = arith.muli %arg0, %c1_i32 : i32
    %1 = arith.addi %0, %arg1 : i32
    %c0_i32 = arith.constant 0 : i32
    %2 = arith.minsi %1, %c0_i32 : i32
    %c0_i32_0 = arith.constant 0 : i32
    %c0_i32_1 = arith.constant 0 : i32
    return %2, %c0_i32_0 : i32, i32
  }
  func.func @transform_2(%arg0: i32, %arg1: i32) -> (i32, i32) {
    %c0_i32 = arith.constant 0 : i32
    %c0_i32_0 = arith.constant 0 : i32
    return %arg0, %c0_i32 : i32, i32
  }
}

</mosaic_0001>

<bundles_post_ra>
// kernel: kullback_leibler.1
= control target key start
LH: loop header
LB: loop body
LE: loop exit
PB: predicated region body
PF: predicated region fallthrough
CT: control target
= control target key end

     0   :  { %s176_s0 = inlined_call_operand.vmem [shape: f32[16,128], index: 0, kind: input, shape index: {}]   ;;  %s177_s1 = inlined_call_operand.vmem [shape: f32[16,128], index: 1, kind: input, shape index: {}]   ;;  %s178_s2 = inlined_call_operand.vmem [shape: f32[8,128], index: 2, kind: output, shape index: {}]  }
   0x1   :  { %v80_v0 = vld [vmem:[%s176_s0] sm:$0xff]  ;;  %v81_v1 = vld [vmem:[%s176_s0 + $0x8] sm:$0xff] }
   0x2   :  { %v84_v2 = vmul.f32 %v80_v0, %v80_v0  ;;  %v85_v3 = vmul.f32 %v81_v1, %v81_v1  ;;  %v82_v4 = vld [vmem:[%s177_s1] sm:$0xff]  ;;  %v83_v5 = vld [vmem:[%s177_s1 + $0x8] sm:$0xff] }
   0x3   :  { %v86_v6 = vmul.f32 %v82_v4, %v82_v4  ;;  %v87_v7 = vmul.f32 %v83_v5, %v83_v5 }
   0x4   :  { %142 = vlog2.f32 %v84_v2 }
   0x5   :  { %144 = vlog2.f32 %v85_v3  ;;  %v88_v8 = vadd.f32 %v86_v6, %v84_v2  ;;  %v89_v10 = vadd.f32 %v87_v7, %v85_v3 }
   0xe   :  { %v143_v9 = vpop.eup %142 }
   0xf   :  { %v145_v11 = vpop.eup %144  ;;  %v91_v12 = vmul.f32 0.6931472, %v143_v9 }
  0x10   :  { %v93_v13 = vmul.f32 0.6931472, %v145_v11 }
  0x11   :  { %v94_v14 = vsub.f32 %v88_v8, %v91_v12 }
  0x12   :  { %v95_v15 = vsub.f32 %v89_v10, %v93_v13 }
  0x14   :  { %v104_v16 = vadd.f32 %v95_v15, %v94_v14 }
  0x16   :  { %106 = vst [vmem:[%s178_s2] sm:$0xff] %v104_v16 }

</bundles_post_ra>
